<compile_context>
chip_gen: v7x
topology: tpu7x:2x2x1
jax: 0.10.0
libtpu: 0.0.40
codegen_flags: <defaults>
</compile_context>

<pallas_src>
import jax
import jax.numpy as jnp
from jax.experimental import pallas as pl
from jax.experimental.pallas import tpu as pltpu


def _mhsa_kernel(x_ref, q2_ref, vbd_ref, o_ref):
    # x_ref:   (Bb, N, D)
    # q2_ref:  (D, H*D)   Q2d[:, h*D:(h+1)*D] = Q[h]
    # vbd_ref: (H*D, D)   block-diagonal: Vbd[h*D:(h+1)*D, h*dh:(h+1)*dh] = V[h]
    # o_ref:   (Bb, N, D)
    Bb, N, D = x_ref.shape
    HD = q2_ref.shape[1]
    H = HD // D

    x3 = x_ref[...]                          # (Bb, N, D)
    x2 = x3.reshape(Bb * N, D)               # merge leading dims (layout-safe)

    # (1) All heads' query projections: one lane-dense (Bb*N, H*D) matmul.
    tmp = jnp.dot(x2, q2_ref[...], preferred_element_type=jnp.float32)
    tmp3 = tmp.reshape(Bb, N, HD)            # split leading dim only

    # Stack heads onto the sublane axis: row f = h*N + n.
    tmpS = jnp.concatenate(
        [tmp3[:, :, h * D:(h + 1) * D] for h in range(H)], axis=1
    )                                        # (Bb, H*N, D)

    # (2) Scores for all heads at once; contraction on the last dims of both
    #     operands -> no explicit transpose of x (no XLU transpose per head).
    scores = jnp.einsum(
        "bfd,bmd->bfm", tmpS, x3, preferred_element_type=jnp.float32
    )                                        # (Bb, H*N, N)

    # Softmax over keys (torch dim=2), numerically stabilized.
    mx = jnp.max(scores, axis=-1, keepdims=True)
    ex = jnp.exp(scores - mx)
    w = ex * pl.reciprocal(jnp.sum(ex, axis=-1, keepdims=True), approx=True)

    # (3) Weighted values for all heads in one batched matmul (M = H*N).
    weighted = jnp.einsum(
        "bfm,bmd->bfd", w, x3, preferred_element_type=jnp.float32
    )                                        # (Bb, H*N, D)

    # (4) Re-stack heads onto the lane axis and apply the block-diagonal V:
    #     one matmul whose (Bb*N, D) result is exactly the torch.cat(dim=2)
    #     layout -> a single dense store.
    wl = jnp.concatenate(
        [weighted[:, h * N:(h + 1) * N, :] for h in range(H)], axis=2
    )                                        # (Bb, N, H*D)
    out = jnp.dot(
        wl.reshape(Bb * N, HD), vbd_ref[...], preferred_element_type=jnp.float32
    )                                        # (Bb*N, D)
    o_ref[...] = out.reshape(Bb, N, D)


def multi_head_self_attention(x, Q, V, n_heads, block_b=None):
    """x: (B, N, D) f32; Q: (H, D, D); V: (H, D, D//H) -> (B, N, D)."""
    B, N, D = x.shape
    H = n_heads
    dh = D // H
    assert Q.shape == (H, D, D) and V.shape == (H, D, dh)

    # ---- host-side (one-time) weight re-layouts ----
    # Heads on the lane axis: a single matmul computes every head's projection.
    Q2d = jnp.transpose(Q, (1, 0, 2)).reshape(D, H * D)
    # Block-diagonal V: head h occupies rows h*D:(h+1)*D, cols h*dh:(h+1)*dh,
    # so (lane-stacked weighted) @ Vbd lands directly in concat(dim=2) layout.
    Vbd = jnp.zeros((H * D, D), dtype=x.dtype)
    for h in range(H):
        Vbd = Vbd.at[h * D:(h + 1) * D, h * dh:(h + 1) * dh].set(V[h])

    # ---- batch block: amortize per-grid-step overhead, push M toward 128 ----
    if block_b is None:
        cap = max(1, 128 // N)
        block_b = 1
        for cand in range(min(B, cap), 0, -1):
            if B % cand == 0:
                block_b = cand
                break
    assert B % block_b == 0
    grid_b = B // block_b
    # NOTE(v7x): a single parallel grid step leaves one TensorCore idle; pass a
    # smaller block_b if two parallel blocks matter more than step amortization.
    # TODO(synk): for production-sized N/D, tile the key dim (flash-style) and
    # the head axis to bound VMEM on v7x; unnecessary at these shapes.

    return pl.pallas_call(
        _mhsa_kernel,
        out_shape=jax.ShapeDtypeStruct((B, N, D), jnp.float32),
        grid_spec=pltpu.PrefetchScalarGridSpec(
            num_scalar_prefetch=0,
            grid=(grid_b,),
            in_specs=[
                pl.BlockSpec((block_b, N, D), lambda b: (b, 0, 0)),
                # Weights: constant block index across the grid (stay resident).
                pl.BlockSpec((D, H * D), lambda b: (0, 0)),
                pl.BlockSpec((H * D, D), lambda b: (0, 0)),
            ],
            out_specs=pl.BlockSpec((block_b, N, D), lambda b: (b, 0, 0)),
        ),
        compiler_params=pltpu.CompilerParams(
            dimension_semantics=("parallel",),
        ),
    )(x, Q2d, Vbd)


def reference(x, Q, V, n_heads):
    """Pure-JAX reference mirroring the PyTorch forward."""
    outs = []
    for h in range(n_heads):
        tmp1 = jnp.einsum("bnd,de->bne", x, Q[h])
        scores = jnp.einsum("bne,bme->bnm", tmp1, x)
        w = jax.nn.softmax(scores, axis=2)
        weighted = jnp.einsum("bnm,bmd->bnd", w, x)
        outs.append(jnp.einsum("bnd,dk->bnk", weighted, V[h]))
    return jnp.concatenate(outs, axis=2)


if __name__ == "__main__":
    # Small shapes consistent with the module's forward.
    B, N, D, H = 2, 8, 32, 4
    dh = D // H

    key = jax.random.PRNGKey(0)
    kx, kq, kv = jax.random.split(key, 3)

    x = jax.random.normal(kx, (B, N, D), dtype=jnp.float32)
    Q = jax.random.uniform(kq, (H, D, D), minval=-0.1, maxval=0.1, dtype=jnp.float32)
    V = jax.random.uniform(kv, (H, D, dh), minval=-0.1, maxval=0.1, dtype=jnp.float32)

    out = multi_head_self_attention(x, Q, V, H)
    out = jax.block_until_ready(out)

    ref = reference(x, Q, V, H)
    assert out.shape == (B, N, D)
    # approx=True reciprocal (EUP) -> slightly looser tolerance than exact f32.
    assert jnp.allclose(out, ref, atol=5e-3, rtol=5e-3), "mismatch vs reference"

    print("KERNEL_OK")
</pallas_src>

<mosaic_0001>
module attributes {stable_mosaic.version = 11 : i64} {
  func.func @_mhsa_kernel(%arg0: i32, %arg1: memref<2x8x32xf32, #tpu.memory_space<vmem>>, %arg2: memref<32x128xf32, #tpu.memory_space<vmem>>, %arg3: memref<128x32xf32, #tpu.memory_space<vmem>>, %arg4: memref<2x8x32xf32, #tpu.memory_space<vmem>>) attributes {dimension_semantics = [#tpu.dimension_semantics<parallel>], iteration_bounds = array<i64: 1>, scalar_prefetch = 0 : i64, scratch_operands = 0 : i64, tpu.core_type = #tpu.core_type<tc>, window_params = [{transform_indices = @transform_0, window_bounds = array<i64: 2, 8, 32>}, {pipeline_mode = #tpu.pipeline_mode<synchronous>, transform_indices = @transform_1, window_bounds = array<i64: 32, 128>}, {pipeline_mode = #tpu.pipeline_mode<synchronous>, transform_indices = @transform_2, window_bounds = array<i64: 128, 32>}, {transform_indices = @transform_3, window_bounds = array<i64: 2, 8, 32>}]} {
    %c0 = arith.constant 0 : index
    %c0_0 = arith.constant 0 : index
    %c0_1 = arith.constant 0 : index
    %0 = vector.load %arg1[%c0, %c0_0, %c0_1] : memref<2x8x32xf32, #tpu.memory_space<vmem>>, vector<2x8x32xf32>
    %1 = vector.shape_cast %0 : vector<2x8x32xf32> to vector<16x32xf32>
    %c0_2 = arith.constant 0 : index
    %c0_3 = arith.constant 0 : index
    %2 = vector.load %arg2[%c0_2, %c0_3] : memref<32x128xf32, #tpu.memory_space<vmem>>, vector<32x128xf32>
    %cst = arith.constant dense<0.000000e+00> : vector<16x128xf32>
    %3 = tpu.matmul %1, %2, %cst {dimension_numbers = #tpu.dot_dimension_numbers<[1], [0], [0], [1], [0, 0, 1, 1], [], []>} : vector<16x32xf32>, vector<32x128xf32>, vector<16x128xf32> -> vector<16x128xf32>
    %4 = vector.shape_cast %3 : vector<16x128xf32> to vector<2x8x128xf32>
    %5 = vector.extract_strided_slice %4 {offsets = [0, 0, 0], sizes = [2, 8, 32], strides = [1, 1, 1]} : vector<2x8x128xf32> to vector<2x8x32xf32>
    %6 = vector.extract_strided_slice %4 {offsets = [0, 0, 32], sizes = [2, 8, 32], strides = [1, 1, 1]} : vector<2x8x128xf32> to vector<2x8x32xf32>
    %7 = vector.extract_strided_slice %4 {offsets = [0, 0, 64], sizes = [2, 8, 32], strides = [1, 1, 1]} : vector<2x8x128xf32> to vector<2x8x32xf32>
    %8 = vector.extract_strided_slice %4 {offsets = [0, 0, 96], sizes = [2, 8, 32], strides = [1, 1, 1]} : vector<2x8x128xf32> to vector<2x8x32xf32>
    %9 = tpu.concatenate %5, %6, %7, %8 in 1 : vector<2x8x32xf32>, vector<2x8x32xf32>, vector<2x8x32xf32>, vector<2x8x32xf32> -> vector<2x32x32xf32>
    "tpu.trace_start"() <{level = 10 : i32, message = "bfd,bmd->bfm"}> : () -> ()
    %cst_4 = arith.constant dense<0.000000e+00> : vector<2x32x8xf32>
    %10 = tpu.matmul %9, %0, %cst_4 {dimension_numbers = #tpu.dot_dimension_numbers<[2], [2], [1], [1], [0, 0, 0, 1, 1, 1], [0], [0]>} : vector<2x32x32xf32>, vector<2x8x32xf32>, vector<2x32x8xf32> -> vector<2x32x8xf32>
    "tpu.trace_stop"() : () -> ()
    %cst_5 = arith.constant dense<0xFF800000> : vector<2x32xf32>
    %11 = vector.multi_reduction <maximumf>, %10, %cst_5 [2] : vector<2x32x8xf32> to vector<2x32xf32>
    %12 = vector.shape_cast %11 : vector<2x32xf32> to vector<2x32x1xf32>
    %13 = vector.broadcast %12 : vector<2x32x1xf32> to vector<2x32x8xf32>
    %14 = arith.subf %10, %13 : vector<2x32x8xf32>
    %15 = math.exp %14 : vector<2x32x8xf32>
    %cst_6 = arith.constant dense<0.000000e+00> : vector<2x32xf32>
    %16 = vector.multi_reduction <add>, %15, %cst_6 [2] : vector<2x32x8xf32> to vector<2x32xf32>
    %17 = vector.shape_cast %16 : vector<2x32xf32> to vector<2x32x1xf32>
    %18 = tpu.reciprocal %17 {approx = true} : vector<2x32x1xf32> -> vector<2x32x1xf32>
    %19 = vector.broadcast %18 : vector<2x32x1xf32> to vector<2x32x8xf32>
    %20 = arith.mulf %15, %19 : vector<2x32x8xf32>
    "tpu.trace_start"() <{level = 10 : i32, message = "bfm,bmd->bfd"}> : () -> ()
    %cst_7 = arith.constant dense<0.000000e+00> : vector<2x32x32xf32>
    %21 = tpu.matmul %20, %0, %cst_7 {dimension_numbers = #tpu.dot_dimension_numbers<[2], [1], [1], [2], [0, 0, 0, 1, 1, 2], [0], [0]>} : vector<2x32x8xf32>, vector<2x8x32xf32>, vector<2x32x32xf32> -> vector<2x32x32xf32>
    "tpu.trace_stop"() : () -> ()
    %22 = vector.extract_strided_slice %21 {offsets = [0, 0, 0], sizes = [2, 8, 32], strides = [1, 1, 1]} : vector<2x32x32xf32> to vector<2x8x32xf32>
    %23 = vector.extract_strided_slice %21 {offsets = [0, 8, 0], sizes = [2, 8, 32], strides = [1, 1, 1]} : vector<2x32x32xf32> to vector<2x8x32xf32>
    %24 = vector.extract_strided_slice %21 {offsets = [0, 16, 0], sizes = [2, 8, 32], strides = [1, 1, 1]} : vector<2x32x32xf32> to vector<2x8x32xf32>
    %25 = vector.extract_strided_slice %21 {offsets = [0, 24, 0], sizes = [2, 8, 32], strides = [1, 1, 1]} : vector<2x32x32xf32> to vector<2x8x32xf32>
    %26 = tpu.concatenate %22, %23, %24, %25 in 2 : vector<2x8x32xf32>, vector<2x8x32xf32>, vector<2x8x32xf32>, vector<2x8x32xf32> -> vector<2x8x128xf32>
    %27 = vector.shape_cast %26 : vector<2x8x128xf32> to vector<16x128xf32>
    %c0_8 = arith.constant 0 : index
    %c0_9 = arith.constant 0 : index
    %28 = vector.load %arg3[%c0_8, %c0_9] : memref<128x32xf32, #tpu.memory_space<vmem>>, vector<128x32xf32>
    %cst_10 = arith.constant dense<0.000000e+00> : vector<16x32xf32>
    %29 = tpu.matmul %27, %28, %cst_10 {dimension_numbers = #tpu.dot_dimension_numbers<[1], [0], [0], [1], [0, 0, 1, 1], [], []>} : vector<16x128xf32>, vector<128x32xf32>, vector<16x32xf32> -> vector<16x32xf32>
    %30 = vector.shape_cast %29 : vector<16x32xf32> to vector<2x8x32xf32>
    %c0_11 = arith.constant 0 : index
    %c0_12 = arith.constant 0 : index
    %c0_13 = arith.constant 0 : index
    %31 = vector.load %arg4[%c0_11, %c0_12, %c0_13] : memref<2x8x32xf32, #tpu.memory_space<vmem>>, vector<2x8x32xf32>
    tpu.vector_store %arg4[%c0_11, %c0_12, %c0_13], %30 {strides = array<i32>} : memref<2x8x32xf32, #tpu.memory_space<vmem>>, vector<2x8x32xf32>,
    return
  }
  func.func @transform_0(%arg0: i32) -> (i32, i32, i32) {
    %c0_i32 = arith.constant 0 : i32
    %c0_i32_0 = arith.constant 0 : i32
    %c0_i32_1 = arith.constant 0 : i32
    return %arg0, %c0_i32, %c0_i32_0 : i32, i32, i32
  }
  func.func @transform_1(%arg0: i32) -> (i32, i32) {
    %c0_i32 = arith.constant 0 : i32
    %c0_i32_0 = arith.constant 0 : i32
    %c0_i32_1 = arith.constant 0 : i32
    return %c0_i32, %c0_i32_0 : i32, i32
  }
  func.func @transform_2(%arg0: i32) -> (i32, i32) {
    %c0_i32 = arith.constant 0 : i32
    %c0_i32_0 = arith.constant 0 : i32
    %c0_i32_1 = arith.constant 0 : i32
    return %c0_i32, %c0_i32_0 : i32, i32
  }
  func.func @transform_3(%arg0: i32) -> (i32, i32, i32) {
    %c0_i32 = arith.constant 0 : i32
    %c0_i32_0 = arith.constant 0 : i32
    %c0_i32_1 = arith.constant 0 : i32
    return %arg0, %c0_i32, %c0_i32_0 : i32, i32, i32
  }
}

</mosaic_0001>

<bundles_post_ra>
// kernel: tpu_custom_call.1
= control target key start
LH: loop header
LB: loop body
LE: loop exit
PB: predicated region body
PF: predicated region fallthrough
CT: control target
= control target key end

     0   :  { %vm21_vm0 = vcmask 261120   ;;  %s1141_s0 = inlined_call_operand.vmem [shape: f32[2,8,32], index: 0, kind: input, shape index: {}]   ;;  %s1142_s1 = inlined_call_operand.vmem [shape: f32[32,128], index: 1, kind: input, shape index: {}]   ;;  %s1143_s2 = inlined_call_operand.vmem [shape: f32[128,32], index: 2, kind: input, shape index: {}]   ;;  %s1144_s3 = inlined_call_operand.hbm [shape: f32[2,8,32], index: 3, kind: output, shape index: {}]  }
   0x1   :  { %v17_v0 = vld [vmem:[%s1142_s1] sm:$0xff]  ;;  %v18_v1 = vld [vmem:[%s1142_s1 + $0x8] sm:$0xff]  ;;  %v19_v2 = vld [vmem:[%s1142_s1 + $0x10] sm:$0xff] }
   0x2   :  { %v869_v3 = vpack.c.bf16 %v18_v1, %v17_v0  ;;  %v20_v4 = vld [vmem:[%s1142_s1 + $0x18] sm:$0xff]  ;;  %v15_v5 = vld [vmem:[%s1141_s0] sm:$0xff] }
   0x3   :  { %v873_v6 = vpack.c.bf16 %v20_v4, %v19_v2  ;;  %799 = vmatprep.mubr.msk.f32.mxu0 %vm21_vm0, %v15_v5  ;;  %818 = vmatprep.subr.mxu1 %v15_v5 }
   0x4   :  { %8 = vsyncpa [#allocation3], 0  ;;  %870 = vmatprep.subr.bf16.mxu0 %v869_v3  ;;  %819 = vmatpush3.msra.mxu1 %v15_v5  ;;  %v16_v7 = vld [vmem:[%s1141_s0 + $0x8] sm:$0xff]  ;;  %s986_s1 = smov 32   ;;  %s987_s24 = smov 96   ;;  %vm303_vm1 = vcmask 64512  }
   0x5   :  { %872 = vmatpush3.bf16.msra.mxu0 %v869_v3  ;;  %s988_s0 = smov 64   ;;  %vm612_vm2 = vcmask 523264   ;;  %vm615_vm3 = vcmask 785408  }
   0x6   :  { %874 = vmatprep.subr.bf16.mxu0 %v873_v6 }
   0x9   :  { %876 = vmatpush3.bf16.msra.mxu0 %v873_v6 }
   0xa   :  { %802 = vmatprep.subr.msk.mxu0 %vm21_vm0, %v15_v5 }
   0xc   :  { %800 = vmatmul.mubr.msk.f32.vlgmr.msra.gmra.mrb[0].mxu0 %vm21_vm0, %v16_v7 }
  0x12   :  { %803 = vmatpush3.xpose.msk.msra.mxu0 %vm21_vm0, %v15_v5 }
  0x13   :  { %810 = vmatprep.subr.msk.mxu0 %vm21_vm0, %v16_v7 }
  0xdf   :  { %v801_v8 = vpop.f32.mrb[0].mxu0 }
  0xe0   :  { %v94_v9 = vpop.f32.mrb[1].mxu0 }
  0xe1   :  { %113 = vrot.lane.b32.xlu1 %v94_v9, %s986_s1  ;;  %105 = vrot.lane.b32.xlu0 %v94_v9, %s987_s24 }
  0xe2   :  { %804 = vmatprep.mubr.msk.f32.mxu0 %vm21_vm0, %v94_v9 }
  0xe5   :  { %107 = vrot.lane.b32.xlu1 %v801_v8, %s987_s24  ;;  %109 = vrot.lane.b32.xlu0 %v94_v9, %s988_s0 }
  0xe9   :  { %115 = vrot.lane.b32.xlu1 %v801_v8, %s986_s1  ;;  %111 = vrot.lane.b32.xlu0 %v801_v8, %s988_s0 }
 0x153   :  { %v106_v10 = vpop.permute.xlu0 %105  ;;  %v114_v11 = vpop.permute.xlu1 %113 }
 0x154   :  { %805 = vmatmul.mubr.msk.f32.vlgmr.msra.gmra.mrb[2].mxu0 %vm21_vm0, %v106_v10 }
 0x155   :  { %811 = vmatpush3.xpose.msk.msra.mxu0 %vm21_vm0, %v16_v7 }
 0x156   :  { %826 = vmatprep.subr.mxu0 %v16_v7 }
 0x157   :  { %v110_v12 = vpop.permute.xlu0 %109  ;;  %v108_v13 = vpop.permute.xlu1 %107 }
 0x158   :  { %807 = vmatprep.mubr.msk.f32.mxu0 %vm21_vm0, %v110_v12 }
 0x159   :  { %808 = vmatmul.mubr.msk.f32.gmra.mrb[4].mxu0 %vm21_vm0, %v114_v11 }
 0x15a   :  { %812 = vmatprep.mubr.msk.f32.mxu0 %vm21_vm0, %v801_v8 }
 0x15b   :  { %v112_v14 = vpop.permute.xlu0 %111  ;;  %v116_v15 = vpop.permute.xlu1 %115 }
 0x15d   :  { %813 = vmatmul.mubr.msk.f32.vlgmr.msra.gmra.mrb[6].mxu0 %vm21_vm0, %v108_v13 }
 0x15e   :  { %815 = vmatprep.mubr.msk.f32.mxu0 %vm21_vm0, %v112_v14  ;;  %827 = vmatpush3.msra.mxu0 %v16_v7 }
 0x161   :  { %816 = vmatmul.mubr.msk.f32.gmra.mrb[8].mxu0 %vm21_vm0, %v116_v15 }
 0x227   :  { %v806_v16 = vpop.f32.mrb[2].mxu0 }
 0x228   :  { %v191_v17 = vpop.f32.mrb[3].mxu0  ;;  %v307_v18 = vsel %vm303_vm1, %v806_v16, -inf }
 0x229   :  { %308 = vmax.xlane.f32.xlu1 %v307_v18  ;;  %v304_v19 = vsel %vm303_vm1, %v191_v17, -inf }
 0x22a   :  { %305 = vmax.xlane.f32.xlu0 %v304_v19 }
 0x22c   :  { %v809_v20 = vpop.f32.mrb[4].mxu0 }
 0x22d   :  { %v201_v21 = vpop.f32.mrb[5].mxu0  ;;  %v313_v30 = vsel %vm303_vm1, %v809_v20, -inf }
 0x22e   :  { %v310_v22 = vsel %vm303_vm1, %v201_v21, -inf }
 0x22f   :  { %311 = vmax.xlane.f32.xlu1 %v310_v22 }
 0x230   :  { %v814_v23 = vpop.f32.mrb[6].mxu0 }
 0x231   :  { %v284_v24 = vpop.f32.mrb[7].mxu0  ;;  %v319_v25 = vsel %vm303_vm1, %v814_v23, -inf }
 0x232   :  { %320 = vmax.xlane.f32.xlu0 %v319_v25  ;;  %v316_v28 = vsel %vm303_vm1, %v284_v24, -inf }
 0x234   :  { %v817_v26 = vpop.f32.mrb[8].mxu0 }
 0x235   :  { %v294_v27 = vpop.f32.mrb[9].mxu0  ;;  %v325_v31 = vsel %vm303_vm1, %v817_v26, -inf }
 0x236   :  { %317 = vmax.xlane.f32.xlu0 %v316_v28  ;;  %v322_v29 = vsel %vm303_vm1, %v294_v27, -inf }
 0x237   :  { %323 = vmax.xlane.f32.xlu1 %v322_v29 }
 0x23a   :  { %314 = vmax.xlane.f32.xlu0 %v313_v30 }
 0x23e   :  { %326 = vmax.xlane.f32.xlu0 %v325_v31 }
 0x2b6   :  { %v309_v32 = vpop.xlane.xlu1 %308 }
 0x2b7   :  { %v329_v33 = vsub.f32 %v806_v16, %v309_v32  ;;  %v306_v34 = vpop.xlane.xlu0 %305  ;;  %v618_v32 = vld [vmem:[%s1143_s2] sm:$0xff] }
 0x2b8   :  { %v328_v35 = vsub.f32 %v191_v17, %v306_v34  ;;  %v620_v34 = vld [vmem:[%s1143_s2 + $0x10] sm:$0xff] }
 0x2b9   :  { %v338_v36 = vmul.f32 1.442695, %v329_v33  ;;  %v619_v33 = vld [vmem:[%s1143_s2 + $0x8] sm:$0xff] }
 0x2ba   :  { %v336_v37 = vmul.f32 1.442695, %v328_v35  ;;  %v877_v35 = vpack.c.bf16 %v619_v33, %v618_v32 }
 0x2bb   :  { %930 = vpow2.f32 %v338_v36  ;;  %v621_v36 = vld [vmem:[%s1143_s2 + $0x18] sm:$0xff] }
 0x2bc   :  { %932 = vpow2.f32 %v336_v37  ;;  %v312_v38 = vpop.xlane.xlu1 %311  ;;  %v881_v37 = vpack.c.bf16 %v621_v36, %v620_v34  ;;  %878 = vmatprep.subr.bf16.mxu1 %v877_v35 }
 0x2bd   :  { %v330_v39 = vsub.f32 %v201_v21, %v312_v38  ;;  %v622_v38 = vld [vmem:[%s1143_s2 + $0x20] sm:$0xff] }
 0x2bf   :  { %v340_v40 = vmul.f32 1.442695, %v330_v39  ;;  %v321_v41 = vpop.xlane.xlu0 %320  ;;  %v623_v39 = vld [vmem:[%s1143_s2 + $0x28] sm:$0xff] }
 0x2c0   :  { %v333_v48 = vsub.f32 %v814_v23, %v321_v41  ;;  %v624_v41 = vld [vmem:[%s1143_s2 + $0x30] sm:$0xff] }
 0x2c1   :  { %934 = vpow2.f32 %v340_v40  ;;  %v885_v40 = vpack.c.bf16 %v623_v39, %v622_v38 }
 0x2c2   :  { %v346_v55 = vmul.f32 1.442695, %v333_v48  ;;  %v629_v48 = vld [vmem:[%s1143_s2 + $0x58] sm:$0xff] }
 0x2c3   :  { %v318_v42 = vpop.xlane.xlu0 %317 }
 0x2c4   :  { %v332_v43 = vsub.f32 %v284_v24, %v318_v42  ;;  %v324_v44 = vpop.xlane.xlu1 %323  ;;  %v625_v42 = vld [vmem:[%s1143_s2 + $0x38] sm:$0xff] }
 0x2c5   :  { %v931_v45 = vpop.eup %930  ;;  %v334_v46 = vsub.f32 %v294_v27, %v324_v44  ;;  %v626_v44 = vld [vmem:[%s1143_s2 + $0x40] sm:$0xff] }
 0x2c6   :  { %v933_v47 = vpop.eup %932  ;;  %v344_v49 = vmul.f32 1.442695, %v332_v43  ;;  %v355_v50 = vsel %vm303_vm1, %v931_v45, 0.0  ;;  %v889_v43 = vpack.c.bf16 %v625_v42, %v624_v41 }
 0x2c7   :  { %v348_v51 = vmul.f32 1.442695, %v334_v46  ;;  %v315_v52 = vpop.xlane.xlu0 %314  ;;  %356 = vadd.xlane.f32.xlu0 %v355_v50  ;;  %v352_v53 = vsel %vm303_vm1, %v933_v47, 0.0 }
 0x2c8   :  { %936 = vpow2.f32 %v344_v49  ;;  %v331_v54 = vsub.f32 %v809_v20, %v315_v52  ;;  %353 = vadd.xlane.f32.xlu1 %v352_v53  ;;  %v630_v52 = vld [vmem:[%s1143_s2 + $0x60] sm:$0xff]  ;;  %v631_v53 = vld [vmem:[%s1143_s2 + $0x68] sm:$0xff] }
 0x2c9   :  { %938 = vpow2.f32 %v348_v51 }
 0x2ca   :  { %v342_v56 = vmul.f32 1.442695, %v331_v54  ;;  %v901_v54 = vpack.c.bf16 %v631_v53, %v630_v52 }
 0x2cb   :  { %v935_v57 = vpop.eup %934  ;;  %v327_v58 = vpop.xlane.xlu0 %326 }
 0x2cc   :  { %940 = vpow2.f32 %v342_v56  ;;  %v335_v59 = vsub.f32 %v817_v26, %v327_v58  ;;  %v358_v60 = vsel %vm303_vm1, %v935_v57, 0.0  ;;  %v633_v56 = vld [vmem:[%s1143_s2 + $0x78] sm:$0xff] }
 0x2cd   :  { %359 = vadd.xlane.f32.xlu1 %v358_v60  ;;  %942 = vpow2.f32 %v346_v55  ;;  %v632_v55 = vld [vmem:[%s1143_s2 + $0x70] sm:$0xff] }
 0x2ce   :  { %v350_v61 = vmul.f32 1.442695, %v335_v59 }
 0x2d0   :  { %944 = vpow2.f32 %v350_v61 }
 0x2d2   :  { %v937_v62 = vpop.eup %936 }
 0x2d3   :  { %v364_v63 = vsel %vm303_vm1, %v937_v62, 0.0  ;;  %v939_v0 = vpop.eup %938 }
 0x2d4   :  { %365 = vadd.xlane.f32.xlu1 %v364_v63  ;;  %v370_v3 = vsel %vm303_vm1, %v939_v0, 0.0 }
 0x2d6   :  { %v941_v1 = vpop.eup %940 }
 0x2d7   :  { %v361_v2 = vsel %vm303_vm1, %v941_v1, 0.0  ;;  %v943_v4 = vpop.eup %942 }
 0x2d8   :  { %362 = vadd.xlane.f32.xlu0 %v361_v2  ;;  %371 = vadd.xlane.f32.xlu1 %v370_v3  ;;  %v367_v5 = vsel %vm303_vm1, %v943_v4, 0.0 }
 0x2da   :  { %v945_v6 = vpop.eup %944 }
 0x2db   :  { %v373_v7 = vsel %vm303_vm1, %v945_v6, 0.0 }
 0x2dc   :  { %368 = vadd.xlane.f32.xlu0 %v367_v5 }
 0x2e0   :  { %374 = vadd.xlane.f32.xlu0 %v373_v7 }
 0x354   :  { %v357_v8 = vpop.xlane.xlu0 %356 }
 0x355   :  { %946 = vrcp.f32 %v357_v8  ;;  %v354_v9 = vpop.xlane.xlu1 %353 }
 0x356   :  { %948 = vrcp.f32 %v354_v9 }
 0x35a   :  { %v360_v10 = vpop.xlane.xlu1 %359 }
 0x35b   :  { %950 = vrcp.f32 %v360_v10 }
 0x35f   :  { %v947_v11 = vpop.eup %946 }
 0x360   :  { %v949_v12 = vpop.eup %948  ;;  %v385_v15 = vmul.f32 %v947_v11, %v931_v45  ;;  %v627_v45 = vld [vmem:[%s1143_s2 + $0x48] sm:$0xff] }
 0x361   :  { %v366_v13 = vpop.xlane.xlu1 %365  ;;  %v384_v14 = vmul.f32 %v949_v12, %v933_v47  ;;  %v893_v46 = vpack.c.bf16 %v627_v45, %v626_v44  ;;  %v628_v47 = vld [vmem:[%s1143_s2 + $0x50] sm:$0xff]  ;;  %s989_s2 = smov [#allocation2]  }
 0x362   :  { %952 = vrcp.f32 %v366_v13  ;;  %v897_v49 = vpack.c.bf16 %v629_v48, %v628_v47 }
 0x363   :  { %820 = vmatprep.mubr.msk.f32.mxu1 %vm303_vm1, %v384_v14 }
 0x364   :  { %821 = vmatmul.mubr.msk.f32.vlgmr.msra.gmra.mrb[0].mxu1 %vm303_vm1, %v385_v15 }
 0x365   :  { %v951_v16 = vpop.eup %950  ;;  %v363_v17 = vpop.xlane.xlu0 %362  ;;  %880 = vmatpush3.bf16.msra.mxu1 %v877_v35 }
 0x366   :  { %954 = vrcp.f32 %v363_v17  ;;  %v372_v18 = vpop.xlane.xlu1 %371  ;;  %v386_v19 = vmul.f32 %v951_v16, %v935_v57  ;;  %882 = vmatprep.subr.bf16.mxu1 %v881_v37  ;;  %v905_v57 = vpack.c.bf16 %v633_v56, %v632_v55 }
 0x367   :  { %956 = vrcp.f32 %v372_v18 }
 0x368   :  { %823 = vmatprep.mubr.msk.f32.mxu1 %vm303_vm1, %v386_v19 }
 0x369   :  { %v369_v20 = vpop.xlane.xlu0 %368  ;;  %884 = vmatpush3.bf16.msra.mxu1 %v881_v37 }
 0x36a   :  { %958 = vrcp.f32 %v369_v20  ;;  %886 = vmatprep.subr.bf16.mxu1 %v885_v40 }
 0x36c   :  { %v953_v21 = vpop.eup %952 }
 0x36d   :  { %v375_v22 = vpop.xlane.xlu0 %374  ;;  %v388_v23 = vmul.f32 %v953_v21, %v937_v62  ;;  %888 = vmatpush3.bf16.msra.mxu1 %v885_v40 }
 0x36e   :  { %960 = vrcp.f32 %v375_v22  ;;  %890 = vmatprep.subr.bf16.mxu1 %v889_v43 }
 0x36f   :  { %828 = vmatprep.mubr.msk.f32.mxu0 %vm303_vm1, %v388_v23 }
 0x370   :  { %v955_v24 = vpop.eup %954 }
 0x371   :  { %v387_v25 = vmul.f32 %v955_v24, %v941_v1  ;;  %v957_v26 = vpop.eup %956  ;;  %892 = vmatpush3.bf16.msra.mxu1 %v889_v43 }
 0x372   :  { %v390_v29 = vmul.f32 %v957_v26, %v939_v0  ;;  %894 = vmatprep.subr.bf16.mxu1 %v893_v46 }
 0x373   :  { %824 = vmatmul.mubr.msk.f32.gmra.mrb[2].mxu1 %vm303_vm1, %v387_v25 }
 0x374   :  { %v959_v27 = vpop.eup %958 }
 0x375   :  { %v389_v28 = vmul.f32 %v959_v27, %v943_v4  ;;  %896 = vmatpush3.bf16.msra.mxu1 %v893_v46 }
 0x376   :  { %898 = vmatprep.subr.bf16.mxu1 %v897_v49 }
 0x377   :  { %829 = vmatmul.mubr.msk.f32.vlgmr.msra.gmra.mrb[10].mxu0 %vm303_vm1, %v389_v28 }
 0x378   :  { %v961_v30 = vpop.eup %960  ;;  %831 = vmatprep.mubr.msk.f32.mxu0 %vm303_vm1, %v390_v29 }
 0x379   :  { %v391_v31 = vmul.f32 %v961_v30, %v945_v6  ;;  %900 = vmatpush3.bf16.msra.mxu1 %v897_v49 }
 0x37a   :  { %902 = vmatprep.subr.bf16.mxu1 %v901_v54 }
 0x37b   :  { %832 = vmatmul.mubr.msk.f32.gmra.mrb[12].mxu0 %vm303_vm1, %v391_v31 }
 0x37d   :  { %904 = vmatpush3.bf16.msra.mxu1 %v901_v54 }
 0x37e   :  { %906 = vmatprep.subr.bf16.mxu1 %v905_v57 }
 0x381   :  { %908 = vmatpush3.bf16.msra.mxu1 %v905_v57 }
 0x437   :  { %v822_v50 = vpop.f32.mrb[0].mxu1 }
 0x438   :  { %v470_v51 = vpop.f32.mrb[1].mxu1 }
 0x446   :  { %v825_v58 = vpop.f32.mrb[2].mxu1 }
 0x447   :  { %v480_v59 = vpop.f32.mrb[3].mxu1 }
 0x44a   :  { %v830_v60 = vpop.f32.mrb[10].mxu0 }
 0x44b   :  { %v915_v61 = vpack.i.bf16 %v830_v60, %v822_v50  ;;  %v567_v62 = vpop.f32.mrb[11].mxu0 }
 0x44d   :  { %916 = vrot.lane.b32.xlu1 %v915_v61, %s986_s1  ;;  %s716_s1 = sshll.u32 %s989_s2, 4  ;;  %s717_s1 = int_to_ptr.vmem [resolvable:$true] %s716_s1 }
 0x44e   :  { %v833_v63 = vpop.f32.mrb[12].mxu0  ;;  %p967_p1 = scmp.lt.s32.totalorder %s717_s1, %s717_s1 }
 0x44f   :  { %v925_v0 = vpack.i.bf16 %v833_v63, %v825_v58  ;;  %v577_v1 = vpop.f32.mrb[13].mxu0 }
 0x450   :  { %v920_v2 = vpack.i.bf16 %v577_v1, %v480_v59 }
 0x451   :  { %926 = vrot.lane.b32.xlu1 %v925_v0, %s987_s24  ;;  %s962_s24 = scalar_lea.vmem %s717_s1, 256 }
 0x452   :  { %921 = vrot.lane.b32.xlu0 %v920_v2, %s988_s0  ;;  %p963_p0 = scmp.ne.s32.totalorder %s717_s1, %s962_s24  ;;  %p968_p2 = scmp.lt.s32.totalorder %s962_s24, %s962_s24 }
 0x454   :  { %p969_p3 = por %p968_p2, %p967_p1 }
 0x456   :  { %p970_p4 = pnand %p969_p3, %p963_p0 }
 0x4bf   :  { %v917_v3 = vpop.permute.xlu1 %916 }
 0x4c0   :  { %v919_v4 = vunpack.i.h.bf16 %v917_v3  ;;  %v918_v5 = vunpack.i.l.bf16 %v917_v3 }
 0x4c2   :  { %v611_v10 = vsel %vm21_vm0, %v567_v62, %v919_v4  ;;  %v610_v13 = vsel %vm21_vm0, %v470_v51, %v918_v5 }
 0x4c3   :  { %v927_v6 = vpop.permute.xlu1 %926 }
 0x4c4   :  { %v922_v7 = vpop.permute.xlu0 %921  ;;  %v929_v11 = vunpack.i.h.bf16 %v927_v6  ;;  %v928_v12 = vunpack.i.l.bf16 %v927_v6 }
 0x4c5   :  { %v924_v8 = vunpack.i.h.bf16 %v922_v7  ;;  %v923_v9 = vunpack.i.l.bf16 %v922_v7 }
 0x4c7   :  { %v614_v14 = vsel %vm612_vm2, %v611_v10, %v924_v8  ;;  %v613_v15 = vsel %vm612_vm2, %v610_v13, %v923_v9 }
 0x4c8   :  { %v616_v16 = vsel %vm615_vm3, %v613_v15, %v928_v12  ;;  %v617_v17 = vsel %vm615_vm3, %v614_v14, %v929_v11 }
 0x4c9   :  { %866 = vmatprep.mubr.f32.mxu1 %v616_v16 }
 0x4ca   :  { %867 = vmatmul.mubr.f32.vlgmr.msra.gmra.mrb[4].mxu1 %v617_v17 }
 0x59d   :  { %v868_v18 = vpop.f32.mrb[4].mxu1 }
 0x59e   :  { %710 = vst.msk [vmem:[#allocation2 + $0x8] sm:$0xff] %vm21_vm0, %v868_v18  ;;  %v700_v19 = vpop.f32.mrb[5].mxu1 }
 0x59f   :  { %709 = vst.msk [vmem:[#allocation2] sm:$0xff] %vm21_vm0, %v700_v19 }
 0x5a0   :  { %973 = shalt.err (!%p970_p4)
}
 0x5a1   :  { %s974_s5 = scalar_lea.hbm %s1144_s3, 256 }
 0x5a2   :  { %p975_p5 = scmp.ne.s32.totalorder %s1144_s3, %s974_s5  ;;  %p978_p6 = scmp.lt.u32.totalorder %s974_s5, %s1144_s3 }
 0x5a4   :  { %p980_p7 = pnand %p978_p6, %p975_p5 }
 0x5a6   :  { %983 = shalt.err (!%p980_p7)
}
 0x5a7   :  { %s990_s10 = smov 128   ;;  %s991_s11 = smov 8  }
 0x5a8   :  { %722 = dma.vmem_to_hbm [thread:$0]  %s717_s1, 256, %s1144_s3, [#allocation3], %s990_s10, %s990_s10, %s991_s11  }
 0x5a9   :  { %984 = dma.done.wait [#allocation3], 256  }
 0x5aa   :  { %985 = vsyncadd [#allocation3], 4294967040 }
 0x5ab   :  { %726 = vsyncpa [#allocation3], 1 }

</bundles_post_ra>
